<compile_context>
chip_gen: v5e
topology: v5e:2x2
jax: 0.10.0
libtpu: 0.0.40
codegen_flags: <defaults>
</compile_context>

<pallas_src>
import jax
import jax.numpy as jnp
from jax.experimental import pallas as pl
from jax.experimental.pallas import tpu as pltpu

_LANE = 128
# Per-stream block cap: 3 streams x 2 buffers x 2 MiB = 12 MiB (v5e-safe).
_MAX_BLOCK_BYTES = 2 * 1024 * 1024
# Below this per-sample size XLA's fused gather+lerp beats the grid overhead.
# TODO(synk): raise to ~128-256 KiB in production; kept tiny so the demo below
# exercises the Pallas kernel at small shapes.
_MIN_PALLAS_BYTES = 4 * 1024


def _cdiv(a, b):
    return -(-a // b)


def _round_up(a, m):
    return _cdiv(a, m) * m


def _prod(xs):
    out = 1
    for x in xs:
        out *= x
    return out


def _mixup_x_kernel(perm_ref, coef_ref, x_ref, xp_ref, xo_ref):
    # perm_ref is only consumed by the index_maps (gather of X[perm[b]]).
    del perm_ref
    c = coef_ref[pl.program_id(0)]            # scalar f32 read from SMEM
    x = x_ref[...].astype(jnp.float32)        # native dtype in HBM, f32 math
    xp = xp_ref[...].astype(jnp.float32)
    # c*x + (1-c)*xp written as a 3-op lerp.
    xo_ref[...] = (xp + c * (x - xp)).astype(xo_ref.dtype)


def _run_mixup_pallas(perm, coeffs, x, block_shape, grid, out_shape):
    ndim = x.ndim
    trailing_zeros = (0,) * (ndim - 2)

    # index_maps receive (grid indices..., *scalar-prefetch refs) positionally.
    def own(b, f, perm_ref, coef_ref):
        return (b, f) + trailing_zeros

    def permuted(b, f, perm_ref, coef_ref):
        return (perm_ref[b], f) + trailing_zeros

    block_bytes = _prod(block_shape) * x.dtype.itemsize
    vmem_limit = None
    if 6 * block_bytes > 12 * 1024 * 1024:    # only huge ragged per-sample slabs
        vmem_limit = min(int(6 * block_bytes * 5 // 4) + (1 << 20),
                         64 * 1024 * 1024)

    grid_spec = pltpu.PrefetchScalarGridSpec(
        num_scalar_prefetch=2,                # perm (int32[B]), coeffs (f32[B])
        grid=grid,
        in_specs=[
            pl.BlockSpec(block_shape, own),        # X[b]
            pl.BlockSpec(block_shape, permuted),   # X[perm[b]]
        ],
        out_specs=pl.BlockSpec(block_shape, own),
    )
    return pl.pallas_call(
        _mixup_x_kernel,
        grid_spec=grid_spec,
        out_shape=jax.ShapeDtypeStruct(out_shape, x.dtype),
        compiler_params=pltpu.CompilerParams(
            dimension_semantics=("parallel", "parallel"),
            vmem_limit_bytes=vmem_limit),
    )(perm, coeffs, x, x)


def _mixup_x_pallas(perm, coeffs, X):
    """Mix X with X[perm] using per-sample coeffs, preserving X.dtype.

    Returns None when the Pallas path does not apply (caller uses plain JAX).
    """
    bs = X.shape[0]
    feat = _prod(X.shape[1:])
    itemsize = X.dtype.itemsize
    if bs < 2 or feat == 0 or feat * itemsize < _MIN_PALLAS_BYTES:
        return None

    if feat % _LANE == 0:
        # Lane-dense slab (free reshape): (B, rows, 128), balanced row tiles.
        rows = feat // _LANE
        max_rows = max(8, _MAX_BLOCK_BYTES // (_LANE * itemsize))
        n_tiles = _cdiv(rows, max_rows)
        if n_tiles == 1:
            tile_rows = rows                  # full extent -> (8,128) rule waived
        else:
            sub = max(8, 32 // itemsize)      # 8 f32 / 16 bf16 / 32 int8 sublanes
            tile_rows = _round_up(_cdiv(rows, n_tiles), sub)
        grid = (bs, _cdiv(rows, tile_rows))
        x3 = X.reshape(bs, rows, _LANE)
        out = _run_mixup_pallas(perm, coeffs, x3, (1, tile_rows, _LANE), grid,
                                (bs, rows, _LANE))
        return out.reshape(X.shape)

    if X.ndim >= 3:
        # Ragged feature count: keep the ORIGINAL shape (no pad / no slice);
        # the last two dims are full-extent blocks, dim 1 is tiled for VMEM.
        trailing = X.shape[2:]
        trailing_elems = _prod(trailing)
        max_elems = max(1, _MAX_BLOCK_BYTES // itemsize)
        t1 = max(1, min(X.shape[1], max_elems // max(trailing_elems, 1)))
        grid = (bs, _cdiv(X.shape[1], t1))
        block = (1, t1) + trailing
        return _run_mixup_pallas(perm, coeffs, X, block, grid, X.shape)

    # TODO(synk): rank-2 X with feat % 128 != 0 would need masked tail stores /
    # pl.BoundedSlice to stay lane-dense; fall back to XLA's fused gather+lerp.
    return None


def _mixup_small_jax(perm, coeffs, T):
    c = coeffs.reshape((-1,) + (1,) * (T.ndim - 1))
    return (c * T.astype(jnp.float32)
            + (1.0 - c) * T[perm].astype(jnp.float32)).astype(T.dtype)


class Mixup:
    """JAX/Pallas port of the PyTorch Mixup module (functional RNG via `key`)."""

    def __init__(self, mix_beta: float):
        self.mix_beta = float(mix_beta)

    def __call__(self, key, X, Y, weight=None):
        bs = X.shape[0]
        k_perm, k_beta = jax.random.split(key)
        perm = jax.random.permutation(k_perm, bs).astype(jnp.int32)
        coeffs = jax.random.beta(
            k_beta, self.mix_beta, self.mix_beta, shape=(bs,)).astype(jnp.float32)

        # X: heavy, HBM-bound -> Pallas kernel (gather of X[perm] in-kernel).
        X_mixed = _mixup_x_pallas(perm, coeffs, X)
        if X_mixed is None:                   # tiny / rank-2-ragged inputs
            X_mixed = _mixup_small_jax(perm, coeffs, X)

        # Y (and weight): tiny -> plain JAX, f32 math, native output dtype.
        Y_mixed = _mixup_small_jax(perm, coeffs, Y)
        if weight is None:
            return X_mixed, Y_mixed
        W_mixed = _mixup_small_jax(perm, coeffs, weight)
        return X_mixed, Y_mixed, W_mixed


def _reference(perm, coeffs, X, Y, W=None):
    c_x = coeffs.reshape((-1,) + (1,) * (X.ndim - 1))
    c_y = coeffs.reshape((-1,) + (1,) * (Y.ndim - 1))
    Xr = (c_x * X.astype(jnp.float32)
          + (1 - c_x) * X[perm].astype(jnp.float32)).astype(X.dtype)
    Yr = (c_y * Y.astype(jnp.float32)
          + (1 - c_y) * Y[perm].astype(jnp.float32)).astype(Y.dtype)
    if W is None:
        return Xr, Yr
    Wr = (coeffs * W.astype(jnp.float32)
          + (1 - coeffs) * W[perm].astype(jnp.float32)).astype(W.dtype)
    return Xr, Yr, Wr


if __name__ == "__main__":
    key = jax.random.PRNGKey(0)
    k_x, k_y, k_w, k_mix1, k_mix2, k_mix3 = jax.random.split(key, 6)

    mixup = Mixup(mix_beta=1.0)

    # --- 1) f32, feat % 128 == 0 -> lane-dense Pallas path, with weight ---
    B, C, H, W = 2, 4, 16, 16
    NC = 8
    X = jax.random.normal(k_x, (B, C, H, W), dtype=jnp.float32)
    Y = jax.random.uniform(k_y, (B, NC), dtype=jnp.float32)
    weight = jax.random.uniform(k_w, (B,), dtype=jnp.float32)

    X_mix, Y_mix, W_mix = mixup(k_mix1, X, Y, weight)
    jax.block_until_ready((X_mix, Y_mix, W_mix))

    k_perm, k_beta = jax.random.split(k_mix1)
    perm = jax.random.permutation(k_perm, B).astype(jnp.int32)
    coeffs = jax.random.beta(k_beta, 1.0, 1.0, shape=(B,)).astype(jnp.float32)
    X_ref, Y_ref, W_ref = _reference(perm, coeffs, X, Y, weight)
    assert jnp.allclose(X_mix, X_ref, atol=1e-5, rtol=1e-5)
    assert jnp.allclose(Y_mix, Y_ref, atol=1e-5, rtol=1e-5)
    assert jnp.allclose(W_mix, W_ref, atol=1e-5, rtol=1e-5)

    # --- 2) f32, ragged feature count -> original-shape Pallas path (no pad) ---
    X2 = jax.random.normal(k_x, (2, 3, 24, 40), dtype=jnp.float32)  # feat=2880
    X2_mix, Y2_mix = mixup(k_mix2, X2, Y)
    jax.block_until_ready((X2_mix, Y2_mix))
    k_perm2, k_beta2 = jax.random.split(k_mix2)
    perm2 = jax.random.permutation(k_perm2, 2).astype(jnp.int32)
    coeffs2 = jax.random.beta(k_beta2, 1.0, 1.0, shape=(2,)).astype(jnp.float32)
    X2_ref, Y2_ref = _reference(perm2, coeffs2, X2, Y)
    assert jnp.allclose(X2_mix, X2_ref, atol=1e-5, rtol=1e-5)
    assert jnp.allclose(Y2_mix, Y2_ref, atol=1e-5, rtol=1e-5)

    # --- 3) bf16, tiny per-sample X -> small-problem plain-JAX fallback ---
    X3 = jax.random.normal(k_x, (2, 3, 10, 10), dtype=jnp.bfloat16)
    X3_mix, Y3_mix = mixup(k_mix3, X3, Y)
    jax.block_until_ready((X3_mix, Y3_mix))
    assert X3_mix.dtype == jnp.bfloat16 and X3_mix.shape == X3.shape
    k_perm3, k_beta3 = jax.random.split(k_mix3)
    perm3 = jax.random.permutation(k_perm3, 2).astype(jnp.int32)
    coeffs3 = jax.random.beta(k_beta3, 1.0, 1.0, shape=(2,)).astype(jnp.float32)
    X3_ref, Y3_ref = _reference(perm3, coeffs3, X3, Y)
    assert jnp.allclose(X3_mix.astype(jnp.float32), X3_ref.astype(jnp.float32),
                        atol=1e-2, rtol=1e-2)
    assert jnp.allclose(Y3_mix, Y3_ref, atol=1e-5, rtol=1e-5)

    print("KERNEL_OK")
</pallas_src>

<mosaic_0001>
module attributes {stable_mosaic.version = 11 : i64} {
  func.func @_mixup_x_kernel(%arg0: i32, %arg1: i32, %arg2: memref<2xi32, #tpu.memory_space<smem>>, %arg3: memref<2xf32, #tpu.memory_space<smem>>, %arg4: memref<1x8x128xf32, #tpu.memory_space<vmem>>, %arg5: memref<1x8x128xf32, #tpu.memory_space<vmem>>, %arg6: memref<1x8x128xf32, #tpu.memory_space<vmem>>) attributes {dimension_semantics = [#tpu.dimension_semantics<parallel>, #tpu.dimension_semantics<parallel>], iteration_bounds = array<i64: 2, 1>, scalar_prefetch = 2 : i64, scratch_operands = 0 : i64, tpu.core_type = #tpu.core_type<tc>, window_params = [{transform_indices = @transform_0, window_bounds = array<i64: 1, 8, 128>}, {transform_indices = @transform_1, window_bounds = array<i64: 1, 8, 128>}, {transform_indices = @transform_2, window_bounds = array<i64: 1, 8, 128>}]} {
    %0 = arith.index_cast %arg0 : i32 to index
    %1 = memref.load %arg3[%0] : memref<2xf32, #tpu.memory_space<smem>>
    %c0 = arith.constant 0 : index
    %c0_0 = arith.constant 0 : index
    %c0_1 = arith.constant 0 : index
    %2 = vector.load %arg4[%c0, %c0_0, %c0_1] : memref<1x8x128xf32, #tpu.memory_space<vmem>>, vector<1x8x128xf32>
    %c0_2 = arith.constant 0 : index
    %c0_3 = arith.constant 0 : index
    %c0_4 = arith.constant 0 : index
    %3 = vector.load %arg5[%c0_2, %c0_3, %c0_4] : memref<1x8x128xf32, #tpu.memory_space<vmem>>, vector<1x8x128xf32>
    %4 = arith.subf %2, %3 : vector<1x8x128xf32>
    %5 = vector.broadcast %1 : f32 to vector<1x8x128xf32>
    %6 = arith.mulf %5, %4 : vector<1x8x128xf32>
    %7 = arith.addf %3, %6 : vector<1x8x128xf32>
    %c0_5 = arith.constant 0 : index
    %c0_6 = arith.constant 0 : index
    %c0_7 = arith.constant 0 : index
    %8 = vector.load %arg6[%c0_5, %c0_6, %c0_7] : memref<1x8x128xf32, #tpu.memory_space<vmem>>, vector<1x8x128xf32>
    tpu.vector_store %arg6[%c0_5, %c0_6, %c0_7], %7 {strides = array<i32>} : memref<1x8x128xf32, #tpu.memory_space<vmem>>, vector<1x8x128xf32>,
    return
  }
  func.func @transform_0(%arg0: i32, %arg1: i32, %arg2: memref<2xi32, #tpu.memory_space<smem>>, %arg3: memref<2xf32, #tpu.memory_space<smem>>) -> (i32, i32, i32) {
    %c0_i32 = arith.constant 0 : i32
    %c0_i32_0 = arith.constant 0 : i32
    return %arg0, %arg1, %c0_i32 : i32, i32, i32
  }
  func.func @transform_1(%arg0: i32, %arg1: i32, %arg2: memref<2xi32, #tpu.memory_space<smem>>, %arg3: memref<2xf32, #tpu.memory_space<smem>>) -> (i32, i32, i32) {
    %0 = arith.index_cast %arg0 : i32 to index
    %1 = memref.load %arg2[%0] : memref<2xi32, #tpu.memory_space<smem>>
    %c0_i32 = arith.constant 0 : i32
    %c0_i32_0 = arith.constant 0 : i32
    return %1, %arg1, %c0_i32 : i32, i32, i32
  }
  func.func @transform_2(%arg0: i32, %arg1: i32, %arg2: memref<2xi32, #tpu.memory_space<smem>>, %arg3: memref<2xf32, #tpu.memory_space<smem>>) -> (i32, i32, i32) {
    %c0_i32 = arith.constant 0 : i32
    %c0_i32_0 = arith.constant 0 : i32
    return %arg0, %arg1, %c0_i32 : i32, i32, i32
  }
}

</mosaic_0001>

<bundles_post_ra>
// kernel: tpu_custom_call.1
= control target key start
LH: loop header
LB: loop body
LE: loop exit
PB: predicated region body
PF: predicated region fallthrough
CT: control target
= control target key end

     0   :  { %s679_s21 = smov [#allocation3]   ;;  %s680_s22 = smov [#allocation4]   ;;  %s933_s0 = inlined_call_operand.hbm [shape: s32[2], index: 0, kind: input, shape index: {}]   ;;  %s934_s2 = inlined_call_operand.hbm [shape: f32[2,8,128], index: 2, kind: input, shape index: {}]   ;;  %s935_s3 = inlined_call_operand.hbm [shape: f32[2,8,128], index: 3, kind: input, shape index: {}]   ;;  %s936_s4 = inlined_call_operand.hbm [shape: f32[2,8,128], index: 4, kind: output, shape index: {}]   ;;  %s937_s1 = inlined_call_operand.hbm [shape: f32[2], index: 1, kind: input, shape index: {}]  }
   0x1   :  { %941 = sst [smem:[#allocation20_spill]] %s934_s2  ;;  %s10_s17 = sshll.u32 %s933_s0, 4  ;;  %s11_s17 = int_to_ptr.hbm [resolvable:$true] %s10_s17 }
   0x2   :  { %s15_s20 = sshll.u32 %s937_s1, 4  ;;  %s16_s20 = int_to_ptr.hbm [resolvable:$true] %s15_s20 }
   0x3   :  { %13 = dma.hbm_to_smem %s11_s17, 16, %s679_s21, [#allocation2] }
   0x4   :  { %18 = dma.hbm_to_smem %s16_s20, 16, %s680_s22, [#allocation2] }
   0x5   :  { %629 = dma.done.wait [#allocation2], 32 }
   0x6   :  { %630 = vsyncadd [#allocation2], 4294967264 }
   0x7   :  { %21 = sfence }
   0x8   :  { %22 = vsyncpa [#allocation6], 0 }
   0x9   :  { %24 = vsyncpa [#allocation6 + $0x1], 0 }
   0xa   :  { %25 = vsyncpa [#allocation9], 0 }
   0xb   :  { %27 = vsyncpa [#allocation9 + $0x1], 0 }
   0xc   :  { %28 = vsyncpa [#allocation7], 0 }
   0xd   :  { %30 = vsyncpa [#allocation7 + $0x1], 0  ;;  %s712_s0 = smov 0   ;;  %s714_s23 = smov 0  }
   0xe   :  { %s716_s1 = smov 0   ;;  %s718_s24 = smov 0  }
   0xf   :  { %s720_s25 = smov 0   ;;  %s722_s26 = smov 0  }
  0x10   :  { %s724_s27 = smov 0   ;;  %s726_s28 = smov 0  }
  0x11   :  { %s728_s29 = smov 0  }
  0x12 LB: > { %942 = sst [smem:[#allocation17_spill]] %s673_s28  ;;  %s368_s30 = sadd.s32 4294967295, %s677_s29   ;;  %s677_s29 = sphi %s728_s29, %s36_s29   ;;  %s673_s28 = sphi %s726_s28, %s960_s28   ;;  %s669_s27 = sphi %s724_s27, %s959_s27   ;;  %s665_s26 = sphi %s722_s26, %s966_s26   ;;  %s661_s25 = sphi %s720_s25, %s965_s25   ;;  %s657_s24 = sphi %s718_s24, %s964_s24   ;;  %s653_s1 = sphi %s716_s1, %s963_s1   ;;  %s649_s23 = sphi %s714_s23, %s962_s23   ;;  %s645_s0 = sphi %s712_s0, %s961_s0  }
  0x13   : > { %s369_s5 = sadd.s32 4294967294, %s677_s29   ;;  %s48_s6 = sadd.s32 1, %s673_s28 }
  0x14   : > { %s57_s7 = sadd.s32 1, %s665_s26  ;;  %p50_p0 = scmp.ge.s32.totalorder %s48_s6, 2 }
  0x15   : > { %p64_p1 = scmp.ne.s32.totalorder %s665_s26, %s661_s25  ;;  %p65_p2 = scmp.eq.s32.totalorder %s677_s29, 0 }
  0x16   : > { %p70_p3 = scmp.ne.s32.totalorder %s661_s25, %s657_s24  ;;  %s968_s6 = smov (%p50_p0, %s48_s6), 0 }
  0x17   : > { %943 = sst [smem:[#allocation18_spill]] %s968_s6  ;;  %p773_p4 = por %p65_p2, %p64_p1 }
  0x18   : > { %p777_p5 = scmp.eq.s32.totalorder %s368_s30, 0  ;;  %s52_s10 = ssub.s32 %s673_s28, %s968_s6 }
  0x19   : > { %s80_s11 = sld [smem:[#allocation3 + %s673_s28]]  ;;  %p55_p6 = scmp.eq.s32.totalorder %s52_s10, 0 }
  0x1a   : > { %p789_p7 = por %p777_p5, %p70_p3  ;;  %s81_s13 = sld [smem:[#allocation3 + %s968_s6]] }
  0x1b   : > { %p126_p8 = scmp.eq.s32.totalorder %s368_s30, 1  ;;  %p132_p10 = scmp.eq.s32.totalorder %s369_s5, 1 }
  0x1c   : > { %s795_s14 = scalar_select %p55_p6, %s665_s26, %s57_s7  }
  0x1d   : > { %p800_p9 = por %p126_p8, %p64_p1  ;;  %p938_p12 = scmp.lt.s32.totalorder %s677_s29, 2 }
  0x1e   : > { %947 = sst [smem:[#allocation19_spill]] %s795_s14  ;;  %p809_p13 = por %p132_p10, %p70_p3 }
  0x1f   : > { %s152_s17 = sand.u32 1, %s665_s26   ;;  %s373_s19 = sshll.u32 %s673_s28, 3 }
  0x20   : > { %s372_s18 = sshll.u32 %s152_s17, 3  ;;  %s950_s2 = sld [smem:[#allocation20_spill]] }
  0x21   : > { %s156_s30 = scalar_lea.vmem [#allocation5], %s372_s18  ;;  %p393_p0 = pnand %p938_p12, %p773_p4 }
  0x22   : > { %s165_s5 = sshll.u32 %s156_s30, 4  ;;  %p376_p1 = scmp.ge.s32.totalorder %s677_s29, 1  ;;  %s166_s5 = int_to_ptr.vmem [resolvable:$true] %s165_s5 }
  0x23   : > { %p191_p3 = scmp.lt.s32.totalorder %s677_s29, 3  ;;  %s153_s10 = scalar_lea.sflag [#allocation6], %s152_s17 }
  0x24   : > { %s87_s20 = sadd.s32 1, %s653_s1  ;;  %p94_p10 = scmp.ne.s32.totalorder %s653_s1, %s649_s23 }
  0x25   : > { %p824_p6 = pnand %p376_p1, %p191_p3  ;;  %p100_p11 = scmp.ne.s32.totalorder %s649_s23, %s645_s0 }
  0x26   : > { %s161_s22 = scalar_lea.hbm %s950_s2, %s373_s19  ;;  %s82_s19 = ssub.s32 %s80_s11, %s81_s13 }
  0x27   : > { %s163_s7 = sshll.u32 %s161_s22, 4  ;;  %p85_p8 = scmp.eq.s32.totalorder %s82_s19, 0  ;;  %s164_s7 = int_to_ptr.hbm [resolvable:$true] %s163_s7 }
  0x28   : > { %395 = dma.hbm_to_vmem [thread:$0]  (!%p393_p0), %s164_s7, 128, %s166_s5, %s153_s10  }
  0x29   : > { %s172_s8 = sand.u32 1, %s653_s1   ;;  %p96_p4 = por %p94_p10, %p65_p2 }
  0x2a   : > { %s835_s21 = scalar_select %p85_p8, %s653_s1, %s87_s20  }
  0x2b   : > { %p841_p12 = por %p100_p11, %p777_p5  ;;  %s374_s22 = sshll.u32 %s172_s8, 3 }
  0x2c   : > { %p953_p0 = scmp.lt.s32.totalorder %s677_s29, 2  ;;  %s176_s5 = scalar_lea.vmem [#allocation8], %s374_s22 }
  0x2d   : > { %s385_s11 = scalar_select %p96_p4, [#allocation3], [#allocation11] }
  0x2e   : > { %p847_p1 = pnand %p953_p0, %p96_p4  ;;  %p955_p3 = pmov %p953_p0 }
  0x2f   : > { %s386_s13 = scalar_select %p96_p4, %s673_s28, 0 }
  0x30   : > { %s970_s11 = smov (!%p955_p3, %s385_s11), [#allocation12]  ;;  %p956_p8 = pmov %p953_p0 }
  0x31   : > { %s186_s9 = sshll.u32 %s176_s5, 4  ;;  %s173_s6 = scalar_lea.sflag [#allocation9], %s172_s8  ;;  %s187_s9 = int_to_ptr.vmem [resolvable:$true] %s186_s9 }
  0x32   : > { %s972_s13 = smov (!%p956_p8, %s386_s13), 0  ;;  %p539_p5 = pneg %p847_p1 }
  0x33   : > { %s177_s0 = sld [smem:[%s970_s11 + %s972_s13]]  ;;  %s542_s13 = scalar_lea.hbm %s935_s3, 16 }
  0x39   : > { %s375_s7 = sshll.u32 %s177_s0, 3 }
  0x3a   : > { %s182_s20 = scalar_lea.hbm %s935_s3, %s375_s7 }
  0x3b   : > { %s184_s2 = sshll.u32 %s182_s20, 4  ;;  %s185_s2 = int_to_ptr.hbm [resolvable:$true] %s184_s2 }
  0x3c   : > { %s535_s14 = sshra.s32 %s185_s2, 4  ;;  %s536_s14 = int_to_ptr.hbm [resolvable:$true] %s535_s14 }
  0x3d   : > { %s537_s28 = scalar_lea.hbm %s536_s14, 8  ;;  %p543_p4 = scmp.lt.s32.totalorder %s536_s14, %s935_s3 }
  0x3e   : > { %p538_p2 = scmp.ne.s32.totalorder %s536_s14, %s537_s28  ;;  %p544_p0 = scmp.lt.s32.totalorder %s542_s13, %s537_s28 }
  0x40   : > { %p540_p11 = pnand %p539_p5, %p538_p2  ;;  %p545_p3 = por %p544_p0, %p543_p4 }
  0x42   : > { %p541_p10 = pneg %p540_p11 }
  0x44   : > { %p546_p8 = pnand %p545_p3, %p541_p10 }
  0x46   : > { %549 = shalt.err (!%p546_p8)
}
  0x47   : > { %400 = dma.hbm_to_vmem [thread:$0]  (!%p847_p1), %s185_s2, 128, %s187_s9, %s173_s6  }
  0x48   : > { %195 = sbr.rel (%p824_p6) target bundleno = 97 (0x61), region = 28  ;;  %s872_s8 = sand.u32 (!%p824_p6), 1, %s661_s25  }
  0x49   : > { %s377_s7 = sshll.u32 (!%p824_p6), %s872_s8, 3  ;;  %s198_s10 = scalar_lea.sflag (!%p824_p6), [#allocation6], %s872_s8 }
  0x4a   : > { %s201_s19 = scalar_lea.vmem (!%p824_p6), [#allocation5], %s377_s7 }
  0x4d   : > { %632 = dma.done.wait (%p789_p7), %s198_s10, 128  }
  0x4e   : > { %634 = vsyncadd (%p789_p7), %s198_s10, 4294967168  ;;  %s207_s2 = sand.u32 1, %s649_s23  }
  0x4f   : > { %s378_s28 = sshll.u32 %s207_s2, 3  ;;  %s208_s6 = scalar_lea.sflag [#allocation9], %s207_s2 }
  0x50   : > { %s211_s14 = scalar_lea.vmem [#allocation8], %s378_s28 }
  0x51   : > { %636 = dma.done.wait (%p841_p12), %s208_s6, 128  }
  0x52   : > { %638 = vsyncadd (%p841_p12), %s208_s6, 4294967168  ;;  %s239_s18 = sld [smem:[#allocation4 + %s669_s27]]  ;;  %s381_s30 = sshll.u32 %s669_s27, 3  ;;  %v240_v0 = vld [vmem:[%s201_s19] sm:$0xff]  ;;  %v241_v1 = vld [vmem:[%s211_s14] sm:$0xff] }
  0x53   : > { %s259_s12 = scalar_lea.hbm %s936_s4, %s381_s30  ;;  %v242_v3 = vsub.f32 %v240_v0, %v241_v1  ;;  %s237_s11 = scalar_lea.vmem [#allocation10], %s377_s7 }
  0x54   : > { %s261_s22 = sshll.u32 %s237_s11, 4  ;;  %s263_s13 = sshll.u32 %s259_s12, 4  ;;  %s262_s22 = int_to_ptr.vmem [resolvable:$true] %s261_s22  ;;  %s264_s13 = int_to_ptr.hbm [resolvable:$true] %s263_s13 }
  0x55   : > { %s248_s17 = scalar_lea.sflag [#allocation7], %s872_s8  ;;  %s579_s0 = sshra.s32 %s264_s13, 4  ;;  %s580_s0 = int_to_ptr.hbm [resolvable:$true] %s579_s0 }
  0x56   : > { %s581_s27 = scalar_lea.hbm %s580_s0, 8  ;;  %s585_s19 = scalar_lea.hbm %s936_s4, 16 }
  0x57   : > { %p582_p7 = scmp.ne.s32.totalorder %s580_s0, %s581_s27  ;;  %p586_p1 = scmp.lt.s32.totalorder %s580_s0, %s936_s4 }
  0x58   : > { %v243_v2 = vstv %s239_s18  ;;  %p587_p2 = scmp.lt.s32.totalorder %s585_s19, %s581_s27 }
  0x59   : > { %v244_v4 = vmul.f32 %v243_v2, %v242_v3  ;;  %p583_p12 = pnand %p582_p7, %p800_p9 }
  0x5a   : > { %p588_p5 = por %p587_p2, %p586_p1 }
  0x5b   : > { %v245_v5 = vadd.f32 %v244_v4, %v241_v1  ;;  %p584_p6 = pneg %p583_p12 }
  0x5d   : > { %246 = vst [vmem:[%s237_s11] sm:$0xff] %v245_v5  ;;  %p589_p11 = pnand %p588_p5, %p584_p6 }
  0x5f   : > { %592 = shalt.err (!%p589_p11)
}
  0x60   : > { %390 = dma.vmem_to_hbm [thread:$0]  (%p800_p9), %s262_s22, 128, %s264_s13, %s248_s17  }
  0x61 PF: > { %s275_s8 = sand.u32 1, %s657_s24   ;;  %p957_p10 = scmp.ge.s32.totalorder %s677_s29, 2 }
  0x62   : > { %s276_s28 = scalar_lea.sflag [#allocation7], %s275_s8 }
  0x63   : > { %p402_p4 = pnand %p957_p10, %p809_p13 }
  0x65   : > { %p403_p0 = pneg %p402_p4 }
  0x67   : > { %640 = dma.done.wait (%p403_p0), %s276_s28, 128  }
  0x68   : > { %642 = vsyncadd (%p403_p0), %s276_s28, 4294967168  ;;  %s36_s29 = sadd.s32 1, %s677_s29   ;;  %s958_s15 = sld [smem:[#allocation19_spill]] }
  0x69   : > { %p33_p3 = scmp.ge.s32.totalorder %s36_s29, 4   ;;  %s959_s27 = sld [smem:[#allocation17_spill]] }
  0x6a   : > { %s960_s28 = sld [smem:[#allocation18_spill]]  ;;  %s961_s0 = smov %s649_s23 }
  0x6b   : > { %s962_s23 = smov %s653_s1  ;;  %s963_s1 = smov %s835_s21 }
  0x6c   : > { %s964_s24 = smov %s661_s25  ;;  %s965_s25 = smov %s665_s26 }
  0x6d   :  { %35 = sbr.rel (!%p33_p3) target bundleno = 18 (0x12), region = 86 }
  0x6e   : > { %s966_s26 = smov %s958_s15 }
  0x72   :  { %282 = vsyncpa [#allocation6], 1 }
  0x73   :  { %284 = vsyncpa [#allocation6 + $0x1], 1 }
  0x74   :  { %285 = vsyncpa [#allocation9], 1 }
  0x75   :  { %287 = vsyncpa [#allocation9 + $0x1], 1 }
  0x76   :  { %288 = vsyncpa [#allocation7], 1 }
  0x77   :  { %290 = vsyncpa [#allocation7 + $0x1], 1 }

</bundles_post_ra>
